<compile_context>
chip_gen: v7x
topology: tpu7x:2x2x1
jax: 0.10.0
libtpu: 0.0.40
codegen_flags: <defaults>
</compile_context>

<pallas_src>
import functools

import jax
import jax.numpy as jnp
import numpy as np
from jax.experimental import pallas as pl
from jax.experimental.pallas import tpu as pltpu

_LANES = 128
_ROW_ALIGN = 32  # uint8 native tile is (32, 128): keep row blocks 32-aligned


def _udf_kernel(x_ref, tens_ref, pooled_ref):
    """One grid step = one (ROWS, HW) slab of (frame, channel) rows.

    x_ref     : (ROWS, HW)  uint8   raw pixels, rows already BGR->RGB ordered
    tens_ref  : (ROWS, HW)  float32 ToTensor() output (scaled to [0, 1])
    pooled_ref: (ROWS, 128) float32 per-row mean over HW, broadcast across all
                                    128 lanes so the store stays unmasked
    """
    x = x_ref[...].astype(jnp.float32) * (1.0 / 255.0)          # VPU elementwise
    tens_ref[...] = x                                            # full-lane vst
    m = jnp.mean(x, axis=-1, keepdims=True)                      # XLU lane reduce
    pooled_ref[...] = jnp.broadcast_to(m, pooled_ref.shape)      # lane-dense store


def _round_up(x, m):
    return (x + m - 1) // m * m


@functools.partial(jax.jit, static_argnames=("block_rows",))
def _tensorize_and_pool(rows_u8, block_rows):
    """Run the streaming kernel over the whole padded (TOTAL_ROWS, HW) slab."""
    total_rows, hw = rows_u8.shape
    grid = total_rows // block_rows
    # Per-step tile bytes: u8 input + f32 tensor out + f32 pooled out.
    tile_bytes = block_rows * (hw * (1 + 4) + _LANES * 4)
    # Double-buffered in/out + margin; clamp so it is safe on v7x (64 MiB/TC).
    vmem_limit = int(min(max(4 * tile_bytes + (4 << 20), 32 << 20), 96 << 20))

    tens_flat, pooled = pl.pallas_call(
        _udf_kernel,
        grid=(grid,),
        in_specs=[pl.BlockSpec((block_rows, hw), lambda i: (i, 0))],
        out_specs=[
            pl.BlockSpec((block_rows, hw), lambda i: (i, 0)),
            pl.BlockSpec((block_rows, _LANES), lambda i: (i, 0)),
        ],
        out_shape=[
            jax.ShapeDtypeStruct((total_rows, hw), jnp.float32),
            jax.ShapeDtypeStruct((total_rows, _LANES), jnp.float32),
        ],
        compiler_params=pltpu.CompilerParams(
            dimension_semantics=("parallel",),
            vmem_limit_bytes=vmem_limit,
        ),
    )(rows_u8)
    return tens_flat, pooled


def pytorch_abstract_udf_forward(frames, w, b, gpu_batch_size=None, block_rows=None):
    """Mirror of PytorchAbstractUDF.forward (+ synthetic _get_predictions head).

    frames: list of uint8 HWC (BGR) arrays.
    Returns (tens_batch NCHW float32 in [0,1], logits (N, K) float32).
    """
    # --- transform(): BGR->RGB flip + HWC->CHW.  Pure index-remap copies on
    # uint8 data that XLA fuses into one pass; the expensive /255 cast happens
    # inside the Pallas kernel on uint8 input.
    batch = jnp.stack([jnp.asarray(f) for f in frames], axis=0)      # (N,H,W,C) u8 BGR
    batch = batch[..., ::-1]                                          # BGR -> RGB
    N, H, W_, C = batch.shape
    HW = H * W_
    rows = jnp.transpose(batch, (0, 3, 1, 2)).reshape(N * C, HW)      # (N*C, HW) u8

    # --- classify(): chunking is done by the Pallas grid (one launch).  Results
    # are identical to the torch.split loop since frames are independent.
    # gpu_batch_size is kept only for API parity.
    del gpu_batch_size

    if block_rows is None:
        # ~4 MiB per tile (u8 in + f32 out + pooled), 32-row aligned.
        target = (4 << 20) // (HW * 5 + _LANES * 4)
        block_rows = max(_ROW_ALIGN, (target // _ROW_ALIGN) * _ROW_ALIGN)
    total_rows = _round_up(N * C, _ROW_ALIGN)
    if total_rows >= 2 * _ROW_ALIGN:
        # Keep >=2 grid steps where possible so v7x's 2 TensorCores both get work.
        block_rows = min(block_rows, (total_rows // 2 // _ROW_ALIGN) * _ROW_ALIGN)
    block_rows = max(_ROW_ALIGN, min(block_rows, total_rows))
    total_rows = _round_up(total_rows, block_rows)

    rows_padded = jnp.zeros((total_rows, HW), jnp.uint8).at[: N * C].set(rows)
    tens_flat, pooled = _tensorize_and_pool(rows_padded, block_rows)

    tens = tens_flat[: N * C].reshape(N, C, H, W_)

    # TODO(synk): _get_predictions is abstract in the PyTorch module; a synthetic
    # linear head (global average pool -> dense) stands in for it here.
    pooled_nc = pooled[: N * C, 0].reshape(N, C)
    logits = pooled_nc @ w + b
    return tens, logits


if __name__ == "__main__":
    key = jax.random.PRNGKey(0)
    k_img, k_w, k_b = jax.random.split(key, 3)

    # Small synthetic "video frames": N=12 frames, 16x16, 3 channels (BGR uint8).
    N, H, W_, C, K = 12, 16, 16, 3, 8
    raw = jax.random.randint(k_img, (N, H, W_, C), 0, 256, dtype=jnp.int32).astype(jnp.uint8)
    frames = [raw[i] for i in range(N)]

    # Deterministic synthetic classifier-head parameters.
    w = jax.random.normal(k_w, (C, K), dtype=jnp.float32) * 0.1
    b = jax.random.normal(k_b, (1, K), dtype=jnp.float32) * 0.01

    tens, logits = pytorch_abstract_udf_forward(frames, w, b)
    tens = jax.block_until_ready(tens)
    logits = jax.block_until_ready(logits)

    # Pure-JAX reference check of the same semantics.
    ref_batch = jnp.stack([jnp.asarray(f) for f in frames], 0)[..., ::-1]
    ref_tens = jnp.transpose(ref_batch, (0, 3, 1, 2)).astype(jnp.float32) / 255.0
    ref_pooled = ref_tens.reshape(N, C, -1).mean(-1)
    ref_logits = ref_pooled @ w + b

    assert tens.shape == (N, C, H, W_) and tens.dtype == jnp.float32
    assert logits.shape == (N, K)
    np.testing.assert_allclose(np.asarray(tens), np.asarray(ref_tens), atol=1e-6)
    np.testing.assert_allclose(np.asarray(logits), np.asarray(ref_logits), atol=1e-5)

    print("KERNEL_OK")
</pallas_src>

<mosaic_0001>
module attributes {stable_mosaic.version = 11 : i64} {
  func.func @_udf_kernel(%arg0: i32, %arg1: memref<32x256xi8, #tpu.memory_space<vmem>>, %arg2: memref<32x256xf32, #tpu.memory_space<vmem>>, %arg3: memref<32x128xf32, #tpu.memory_space<vmem>>) attributes {dimension_semantics = [#tpu.dimension_semantics<parallel>], iteration_bounds = array<i64: 2>, scalar_prefetch = 0 : i64, scratch_operands = 0 : i64, tpu.core_type = #tpu.core_type<tc>, window_params = [{transform_indices = @transform_0, window_bounds = array<i64: 32, 256>}, {transform_indices = @transform_1, window_bounds = array<i64: 32, 256>}, {transform_indices = @transform_2, window_bounds = array<i64: 32, 128>}]} {
    %c0 = arith.constant 0 : index
    %c0_0 = arith.constant 0 : index
    %0 = vector.load %arg1[%c0, %c0_0] : memref<32x256xi8, #tpu.memory_space<vmem>>, vector<32x256xi8>
    %1 = arith.uitofp %0 : vector<32x256xi8> to vector<32x256xf32>
    %cst = arith.constant 0.00392156886 : f32
    %2 = vector.broadcast %cst : f32 to vector<32x256xf32>
    %3 = arith.mulf %1, %2 : vector<32x256xf32>
    %c0_1 = arith.constant 0 : index
    %c0_2 = arith.constant 0 : index
    %4 = vector.load %arg2[%c0_1, %c0_2] : memref<32x256xf32, #tpu.memory_space<vmem>>, vector<32x256xf32>
    tpu.vector_store %arg2[%c0_1, %c0_2], %3 {strides = array<i32>} : memref<32x256xf32, #tpu.memory_space<vmem>>, vector<32x256xf32>,
    %cst_3 = arith.constant dense<0.000000e+00> : vector<32xf32>
    %5 = vector.multi_reduction <add>, %3, %cst_3 [1] : vector<32x256xf32> to vector<32xf32>
    %6 = vector.shape_cast %5 : vector<32xf32> to vector<32x1xf32>
    %cst_4 = arith.constant 2.560000e+02 : f32
    %7 = vector.broadcast %cst_4 : f32 to vector<32x1xf32>
    %8 = arith.divf %6, %7 : vector<32x1xf32>
    %9 = vector.shape_cast %8 : vector<32x1xf32> to vector<32x1xf32>
    %10 = vector.broadcast %9 : vector<32x1xf32> to vector<32x128xf32>
    %c0_5 = arith.constant 0 : index
    %c0_6 = arith.constant 0 : index
    %11 = vector.load %arg3[%c0_5, %c0_6] : memref<32x128xf32, #tpu.memory_space<vmem>>, vector<32x128xf32>
    tpu.vector_store %arg3[%c0_5, %c0_6], %10 {strides = array<i32>} : memref<32x128xf32, #tpu.memory_space<vmem>>, vector<32x128xf32>,
    return
  }
  func.func @transform_0(%arg0: i32) -> (i32, i32) {
    %c0_i32 = arith.constant 0 : i32
    %c0_i32_0 = arith.constant 0 : i32
    return %arg0, %c0_i32 : i32, i32
  }
  func.func @transform_1(%arg0: i32) -> (i32, i32) {
    %c0_i32 = arith.constant 0 : i32
    %c0_i32_0 = arith.constant 0 : i32
    return %arg0, %c0_i32 : i32, i32
  }
  func.func @transform_2(%arg0: i32) -> (i32, i32) {
    %c0_i32 = arith.constant 0 : i32
    %c0_i32_0 = arith.constant 0 : i32
    return %arg0, %c0_i32 : i32, i32
  }
}

</mosaic_0001>

<bundles_post_ra>
// kernel: _tensorize_and_pool.1
= control target key start
LH: loop header
LB: loop body
LE: loop exit
PB: predicated region body
PF: predicated region fallthrough
CT: control target
= control target key end

     0   :  { %8 = vsyncpa [#allocation3], 0  ;;  %s804_s0 = inlined_call_operand.hbm [shape: u8[64,256], index: 0, kind: input, shape index: {}]   ;;  %s805_s1 = inlined_call_operand.hbm [shape: f32[64,256], index: 1, kind: output, shape index: {0}]   ;;  %s806_s2 = inlined_call_operand.hbm [shape: f32[64,128], index: 2, kind: output, shape index: {1}]  }
   0x1   :  { %10 = vsyncpa [#allocation3 + $0x1], 0 }
   0x2   :  { %11 = vsyncpa [#allocation4], 0 }
   0x3   :  { %13 = vsyncpa [#allocation4 + $0x1], 0 }
   0x4   :  { %14 = vsyncpa [#allocation7], 0 }
   0x5   :  { %16 = vsyncpa [#allocation7 + $0x1], 0  ;;  %s607_s9 = smov 0   ;;  %s609_s10 = smov 0  }
   0x6   :  { %s611_s11 = smov 0   ;;  %s613_s12 = smov 0  }
   0x7 LB: > { %s628_s13 = sadd.s32 4294967295, %s583_s12   ;;  %s377_s14 = sadd.s32 4294967294, %s583_s12   ;;  %s583_s12 = sphi %s613_s12, %s821_s12   ;;  %s579_s11 = sphi %s611_s11, %s820_s11   ;;  %s575_s10 = sphi %s609_s10, %s819_s10   ;;  %s571_s9 = sphi %s607_s9, %s818_s9  }
   0x8   : > { %s632_s15 = sadd.s32 1, %s583_s12   ;;  %s29_s16 = sadd.s32 1, %s579_s11 }
   0x9   : > { %s26_s17 = ssub.s32 %s583_s12, %s632_s15  ;;  %p36_p0 = scmp.ne.s32.totalorder %s579_s11, %s575_s10 }
   0xa   : > { %p27_p1 = scmp.eq.s32.totalorder %s26_s17, 0  ;;  %p37_p2 = scmp.eq.s32.totalorder %s583_s12, 0 }
   0xb   : > { %p42_p3 = scmp.ne.s32.totalorder %s575_s10, %s571_s9  ;;  %p43_p4 = scmp.eq.s32.totalorder %s628_s13, 0 }
   0xc   : > { %s644_s18 = scalar_select %p27_p1, %s579_s11, %s29_s16  }
   0xd   : > { %p646_p5 = por %p37_p2, %p36_p0  ;;  %p650_p6 = por %p43_p4, %p42_p3 }
   0xe   : > { %p66_p7 = scmp.eq.s32.totalorder %s628_s13, 1  ;;  %p72_p8 = scmp.eq.s32.totalorder %s377_s14, 1 }
   0xf   : > { %p417_p10 = scmp.lt.s32.totalorder %s583_s12, 2  ;;  %s118_s23 = sand.u32 1, %s579_s11  }
  0x10   : > { %p657_p11 = por %p66_p7, %p36_p0  ;;  %p661_p12 = por %p72_p8, %p42_p3 }
  0x11   : > { %s396_s24 = sshll.u32 %s583_s12, 8  ;;  %s380_s25 = sshll.u32 %s118_s23, 4 }
  0x12   : > { %s810_s21 = scalar_select %p657_p11, 1, 0 }
  0x13   : > { %s811_s22 = scalar_select %p661_p12, 1, 0 }
  0x14   : > { %s670_s28 = scalar_lea.hbm %s804_s0, %s396_s24  ;;  %s122_s29 = scalar_lea.vmem [#allocation2], %s380_s25 }
  0x15   : > { %s130_s30 = sshll.u32 %s122_s29, 4  ;;  %p674_p13 = pnand %p417_p10, %p646_p5  ;;  %s678_s30 = int_to_ptr.vmem [resolvable:$true] %s130_s30 }
  0x16   : > { %s119_s4 = scalar_lea.sflag [#allocation3], %s118_s23  ;;  %s455_s5 = scalar_lea.hbm %s670_s28, 256 }
  0x17   : > { %p456_p2 = scmp.ne.s32.totalorder %s670_s28, %s455_s5  ;;  %p457_p3 = pneg %p674_p13 }
  0x18   : > { %s460_s8 = scalar_lea.hbm %s804_s0, 512  ;;  %p461_p5 = scmp.lt.u32.totalorder %s670_s28, %s804_s0 }
  0x19   : > { %p458_p4 = pnand %p457_p3, %p456_p2  ;;  %p462_p8 = scmp.lt.u32.totalorder %s460_s8, %s455_s5 }
  0x1a   : > { %p464_p9 = scmp.lt.u32.totalorder %s455_s5, %s670_s28 }
  0x1b   : > { %p459_p7 = pneg %p458_p4  ;;  %p463_p10 = por %p462_p8, %p461_p5 }
  0x1d   : > { %p465_p0 = por %p464_p9, %p463_p10 }
  0x1f   : > { %p466_p1 = pnand %p465_p0, %p459_p7 }
  0x21   : > { %469 = shalt.err (!%p466_p1)
}
  0x22   : > { %s470_s17 = scalar_lea.vmem %s678_s30, 256  ;;  %s585_s19 = smov [#allocation2]  }
  0x23   : > { %p471_p2 = scmp.ne.s32.totalorder %s678_s30, %s470_s17  ;;  %s475_s23 = sshll.u32 %s585_s19, 4  ;;  %s476_s23 = int_to_ptr.vmem [resolvable:$false] %s475_s23 }
  0x24   : > { %s477_s24 = scalar_lea.vmem %s476_s23, 512  ;;  %p478_p11 = scmp.lt.s32.totalorder %s678_s30, %s476_s23 }
  0x25   : > { %p473_p4 = pnand %p471_p2, %p457_p3  ;;  %p479_p5 = scmp.lt.s32.totalorder %s477_s24, %s470_s17 }
  0x27   : > { %p474_p12 = pneg %p473_p4  ;;  %p480_p8 = por %p479_p5, %p478_p11 }
  0x29   : > { %p481_p9 = pnand %p480_p8, %p474_p12 }
  0x2b   : > { %484 = shalt.err (!%p481_p9)
}
  0x2c   : > { %409 = dma.hbm_to_vmem [thread:$0]  (!%p674_p13), %s670_s28, 256, %s678_s30, %s119_s4  }
  0x2d   : > { %p813_p0 = scmp.lt.s32.totalorder %s583_s12, 3  ;;  %p814_p1 = scmp.ge.s32.totalorder %s583_s12, 1 }
  0x2f   : > { %p136_p3 = pnand %p814_p1, %p813_p0 }
  0x30   : > { %s712_s25 = sand.u32 (!%p136_p3), 1, %s575_s10  }
  0x31   : > { %139 = sbr.rel (%p136_p3) target bundleno = 232 (0xe8), region = 24  ;;  %s384_s26 = sshll.u32 (!%p136_p3), %s712_s25, 4 }
  0x32   : > { %s142_s27 = scalar_lea.sflag (!%p136_p3), [#allocation3], %s712_s25  ;;  %s145_s29 = scalar_lea.vmem (!%p136_p3), [#allocation2], %s384_s26 }
  0x38   : > { %558 = dma.done.wait (%p650_p6), %s142_s27, 256  }
  0x39   : > { %560 = vsyncadd (%p650_p6), %s142_s27, 4294967040  ;;  %v173_v0 = vld [vmem:[%s145_s29] sm:$0xff]  ;;  %v174_v1 = vld [vmem:[%s145_s29 + $0x8] sm:$0xff]  ;;  %s385_s28 = sshll.u32 %s712_s25, 6  ;;  %s398_s3 = sshll.u32 %s628_s13, 10 }
  0x3a   : > { %v179_v2 = vunpack.c.2.s8 %v173_v0  ;;  %v180_v3 = vunpack.c.2.s8 %v174_v1  ;;  %v175_v4 = vunpack.c.0.s8 %v173_v0  ;;  %v176_v5 = vunpack.c.0.s8 %v174_v1  ;;  %s163_s20 = scalar_lea.vmem [#allocation5], %s385_s28  ;;  %s727_s6 = scalar_lea.hbm %s805_s1, %s398_s3 }
  0x3b   : > { %v181_v6 = vunpack.c.3.s8 %v173_v0  ;;  %v182_v7 = vunpack.c.3.s8 %v174_v1  ;;  %v177_v8 = vunpack.c.1.s8 %v173_v0  ;;  %v178_v9 = vunpack.c.1.s8 %v174_v1  ;;  %s256_s30 = sshll.u32 %s163_s20, 4  ;;  %s237_s7 = scalar_lea.sflag [#allocation4], %s712_s25  ;;  %s721_s30 = int_to_ptr.vmem [resolvable:$true] %s256_s30 }
  0x3c   : > { %v187_v10 = vand.u32 255, %v179_v2  ;;  %v188_v11 = vand.u32 255, %v180_v3  ;;  %v183_v12 = vand.u32 255, %v175_v4  ;;  %v184_v13 = vand.u32 255, %v176_v5  ;;  %s485_s8 = scalar_lea.vmem %s721_s30, 1024  ;;  %p815_p11 = scmp.ne.s32.totalorder %s810_s21, 0 }
  0x3d   : > { %v189_v14 = vand.u32 255, %v181_v6  ;;  %v190_v15 = vand.u32 255, %v182_v7  ;;  %v185_v16 = vand.u32 255, %v177_v8  ;;  %v186_v17 = vand.u32 255, %v178_v9  ;;  %p486_p6 = scmp.ne.s32.totalorder %s721_s30, %s485_s8  ;;  %s586_s14 = smov [#allocation5]  }
  0x3e   : > { %v195_v18 = vcvt.s32.f32 %v187_v10  ;;  %v196_v19 = vcvt.s32.f32 %v188_v11  ;;  %v191_v20 = vcvt.s32.f32 %v183_v12  ;;  %v192_v21 = vcvt.s32.f32 %v184_v13  ;;  %s489_s16 = sshll.u32 %s586_s14, 4  ;;  %s490_s16 = int_to_ptr.vmem [resolvable:$false] %s489_s16 }
  0x3f   : > { %v197_v22 = vcvt.s32.f32 %v189_v14  ;;  %v198_v23 = vcvt.s32.f32 %v190_v15  ;;  %v193_v24 = vcvt.s32.f32 %v185_v16  ;;  %v194_v25 = vcvt.s32.f32 %v186_v17  ;;  %p487_p12 = pnand %p486_p6, %p815_p11  ;;  %s491_s17 = scalar_lea.vmem %s490_s16, 2048 }
  0x40   : > { %v203_v26 = vmul.f32 0.003921569, %v195_v18  ;;  %v204_v27 = vmul.f32 0.003921569, %v196_v19  ;;  %v199_v28 = vmul.f32 0.003921569, %v191_v20  ;;  %p492_p7 = scmp.lt.s32.totalorder %s721_s30, %s490_s16  ;;  %p493_p10 = scmp.lt.s32.totalorder %s491_s17, %s485_s8 }
  0x41   : > { %v200_v29 = vmul.f32 0.003921569, %v192_v21  ;;  %v205_v30 = vmul.f32 0.003921569, %v197_v22  ;;  %v206_v31 = vmul.f32 0.003921569, %v198_v23  ;;  %p488_p13 = pneg %p487_p12 }
  0x42   : > { %212 = vst [vmem:[%s163_s20 + $0x28] sm:$0xff] %v204_v27  ;;  %v221_v32 = vadd.f32 %v204_v27, %v203_v26  ;;  %211 = vst [vmem:[%s163_s20 + $0x20] sm:$0xff] %v203_v26  ;;  %v201_v33 = vmul.f32 0.003921569, %v193_v24  ;;  %v202_v34 = vmul.f32 0.003921569, %v194_v25  ;;  %p494_p2 = por %p493_p10, %p492_p7 }
  0x43   : > { %207 = vst [vmem:[%s163_s20] sm:$0xff] %v199_v28  ;;  %208 = vst [vmem:[%s163_s20 + $0x8] sm:$0xff] %v200_v29  ;;  %v215_v35 = vadd.f32 %v200_v29, %v199_v28  ;;  %v224_v36 = vadd.f32 %v206_v31, %v205_v30 }
  0x44   : > { %213 = vst [vmem:[%s163_s20 + $0x30] sm:$0xff] %v205_v30  ;;  %214 = vst [vmem:[%s163_s20 + $0x38] sm:$0xff] %v206_v31  ;;  %222 = vadd.xlane.f32.xlu1 %v221_v32  ;;  %v218_v37 = vadd.f32 %v202_v34, %v201_v33  ;;  %p495_p4 = pnand %p494_p2, %p488_p13 }
  0x45   : > { %209 = vst [vmem:[%s163_s20 + $0x10] sm:$0xff] %v201_v33  ;;  %210 = vst [vmem:[%s163_s20 + $0x18] sm:$0xff] %v202_v34  ;;  %216 = vadd.xlane.f32.xlu0 %v215_v35 }
  0x48   : > { %225 = vadd.xlane.f32.xlu1 %v224_v36 }
  0x49   : > { %219 = vadd.xlane.f32.xlu0 %v218_v37 }
  0x4a   : > { %498 = shalt.err (!%p495_p4)
}
  0x4b   : > { %s499_s19 = scalar_lea.hbm %s727_s6, 1024  ;;  %s503_s26 = scalar_lea.hbm %s805_s1, 2048 }
  0x4c   : > { %p500_p5 = scmp.ne.s32.totalorder %s727_s6, %s499_s19  ;;  %p504_p0 = scmp.lt.u32.totalorder %s727_s6, %s805_s1 }
  0x4d   : > { %p505_p1 = scmp.lt.u32.totalorder %s503_s26, %s499_s19  ;;  %p507_p6 = scmp.lt.u32.totalorder %s499_s19, %s727_s6 }
  0x4e   : > { %p501_p8 = pnand %p500_p5, %p815_p11 }
  0x4f   : > { %p506_p3 = por %p505_p1, %p504_p0 }
  0x50   : > { %p502_p9 = pneg %p501_p8 }
  0x51   : > { %p508_p12 = por %p507_p6, %p506_p3 }
  0x53   : > { %p509_p13 = pnand %p508_p12, %p502_p9 }
  0x55   : > { %512 = shalt.err (!%p509_p13)
}
  0x56   : > { %s587_s28 = smov 256   ;;  %s588_s20 = smov 16  }
  0x57   : > { %402 = dma.vmem_to_hbm [thread:$0]  (%p815_p11), %s721_s30, 1024, %s727_s6, %s237_s7, %s587_s28, %s587_s28, %s588_s20  }
  0x58   : > { %s386_s3 = sshll.u32 %s712_s25, 5  ;;  %s399_s8 = sshll.u32 %s628_s13, 9 }
  0x59   : > { %s170_s4 = scalar_lea.vmem [#allocation6], %s386_s3  ;;  %s760_s7 = scalar_lea.hbm %s806_s2, %s399_s8 }
  0x5a   : > { %s272_s5 = sshll.u32 %s170_s4, 4  ;;  %s242_s14 = scalar_lea.sflag [#allocation7], %s712_s25  ;;  %s755_s5 = int_to_ptr.vmem [resolvable:$true] %s272_s5 }
  0x5b   : > { %s513_s13 = scalar_lea.vmem %s755_s5, 512  ;;  %s589_s16 = smov [#allocation6]  }
  0x5c   : > { %p514_p7 = scmp.ne.s32.totalorder %s755_s5, %s513_s13  ;;  %s517_s17 = sshll.u32 %s589_s16, 4  ;;  %s518_s17 = int_to_ptr.vmem [resolvable:$false] %s517_s17 }
  0x5d   : > { %s519_s19 = scalar_lea.vmem %s518_s17, 1024  ;;  %p520_p4 = scmp.lt.s32.totalorder %s755_s5, %s518_s17 }
  0x5e   : > { %p515_p10 = pnand %p514_p7, %p815_p11  ;;  %p521_p5 = scmp.lt.s32.totalorder %s519_s19, %s513_s13 }
  0x60   : > { %p516_p2 = pneg %p515_p10  ;;  %p522_p8 = por %p521_p5, %p520_p4 }
  0x62   : > { %p523_p9 = pnand %p522_p8, %p516_p2 }
  0xd1   : > { %v223_v38 = vpop.xlane.xlu1 %222 }
  0xd2   : > { %v230_v39 = vmul.f32 0.00390625, %v223_v38  ;;  %v217_v40 = vpop.xlane.xlu0 %216 }
  0xd3   : > { %v228_v41 = vmul.f32 0.00390625, %v217_v40 }
  0xd4   : > { %234 = vst [vmem:[%s170_s4 + $0x10] sm:$0xff] %v230_v39 }
  0xd5   : > { %232 = vst [vmem:[%s170_s4] sm:$0xff] %v228_v41  ;;  %v226_v42 = vpop.xlane.xlu1 %225 }
  0xd6   : > { %v231_v43 = vmul.f32 0.00390625, %v226_v42  ;;  %v220_v44 = vpop.xlane.xlu0 %219 }
  0xd7   : > { %v229_v45 = vmul.f32 0.00390625, %v220_v44 }
  0xd8   : > { %235 = vst [vmem:[%s170_s4 + $0x18] sm:$0xff] %v231_v43 }
  0xd9   : > { %233 = vst [vmem:[%s170_s4 + $0x8] sm:$0xff] %v229_v45 }
  0xda   : > { %526 = shalt.err (!%p523_p9)
}
  0xdb   : > { %s527_s23 = scalar_lea.hbm %s760_s7, 512  ;;  %s531_s27 = scalar_lea.hbm %s806_s2, 1024 }
  0xdc   : > { %p528_p0 = scmp.ne.s32.totalorder %s760_s7, %s527_s23  ;;  %p532_p6 = scmp.lt.u32.totalorder %s760_s7, %s806_s2 }
  0xdd   : > { %p533_p12 = scmp.lt.u32.totalorder %s531_s27, %s527_s23  ;;  %p535_p7 = scmp.lt.u32.totalorder %s527_s23, %s760_s7 }
  0xde   : > { %p529_p1 = pnand %p528_p0, %p815_p11 }
  0xdf   : > { %p534_p13 = por %p533_p12, %p532_p6 }
  0xe0   : > { %p530_p3 = pneg %p529_p1 }
  0xe1   : > { %p536_p10 = por %p535_p7, %p534_p13 }
  0xe3   : > { %p537_p2 = pnand %p536_p10, %p530_p3 }
  0xe5   : > { %540 = shalt.err (!%p537_p2)
}
  0xe6   : > { %s590_s20 = smov 128   ;;  %s591_s3 = smov 8  }
  0xe7   : > { %403 = dma.vmem_to_hbm [thread:$0]  (%p815_p11), %s755_s5, 512, %s760_s7, %s242_s14, %s590_s20, %s590_s20, %s591_s3  }
  0xe8 PF: > { %s287_s4 = sand.u32 1, %s571_s9   ;;  %p816_p4 = scmp.ne.s32.totalorder %s811_s22, 0 }
  0xe9   : > { %p817_p5 = scmp.ge.s32.totalorder %s583_s12, 2  ;;  %s288_s8 = scalar_lea.sflag [#allocation4], %s287_s4 }
  0xeb   : > { %p411_p8 = pnand %p817_p5, %p816_p4 }
  0xed   : > { %562 = dma.done.wait (!%p411_p8), %s288_s8, 1024  }
  0xee   : > { %564 = vsyncadd (!%p411_p8), %s288_s8, 4294966272  ;;  %s297_s30 = scalar_lea.sflag [#allocation7], %s287_s4 }
  0xef   : > { %566 = dma.done.wait (!%p411_p8), %s297_s30, 512  }
  0xf0   : > { %568 = vsyncadd (!%p411_p8), %s297_s30, 4294966784  ;;  %p19_p11 = scmp.ge.s32.totalorder %s632_s15, 4   ;;  %s818_s9 = smov %s575_s10 }
  0xf1   : > { %s819_s10 = smov %s579_s11  ;;  %s820_s11 = smov %s644_s18 }
  0xf2   : > { %s821_s12 = smov %s632_s15  ;;  %21 = sbr.rel (!%p19_p11) target bundleno = 7 (0x7), region = 86 }
  0xf9   :  { %302 = vsyncpa [#allocation3], 1 }
  0xfa   :  { %304 = vsyncpa [#allocation3 + $0x1], 1 }
  0xfb   :  { %305 = vsyncpa [#allocation4], 1 }
  0xfc   :  { %307 = vsyncpa [#allocation4 + $0x1], 1 }
  0xfd   :  { %308 = vsyncpa [#allocation7], 1 }
  0xfe   :  { %310 = vsyncpa [#allocation7 + $0x1], 1 }

</bundles_post_ra>
